<compile_context>
chip_gen: v5e
topology: v5e:2x2
jax: 0.10.0
libtpu: 0.0.40
codegen_flags: <defaults>
</compile_context>

<pallas_src>
import jax
import jax.numpy as jnp
from jax.experimental import pallas as pl
from jax.experimental.pallas import tpu as pltpu


def _round_up(x, m):
    return ((x + m - 1) // m) * m


def _sqdiff_partial_kernel(o1_ref, o2_ref, out_ref):
    # o1_ref / o2_ref: (TILE_B, TILE_D) tiles in VMEM, native dtype.
    # out_ref:         (1, 1, 1, 1) f32 partial sum for this (i, j) tile.
    a = o1_ref[...].astype(jnp.float32)
    b = o2_ref[...].astype(jnp.float32)
    d = b - a
    out_ref[...] = jnp.sum(d * d).reshape(1, 1, 1, 1)


def _choose_tiles(B, D, itemsize):
    """Pick (tile_b, tile_d) so one input tile is ~2 MiB.

    With 2 inputs x 2 pipeline buffers that is ~8 MiB of VMEM, comfortably
    inside the scoped default (16 MiB v5e, 32 MiB v6e/v7x; 64 MiB physical
    on v7x) — no vmem_limit_bytes override needed, portable across gens.
    """
    target_bytes = 2 * 1024 * 1024
    max_tile_d = 4096  # lane-dim chunk, multiple of 128

    if D <= max_tile_d:
        tile_d = D  # full feature dim per block (always a legal block dim)
    else:
        d128 = _round_up(D, 128)
        n_d = pl.cdiv(d128, max_tile_d)
        tile_d = _round_up(pl.cdiv(d128, n_d), 128)   # balanced, minimal padding

    rows = (target_bytes // max(tile_d * itemsize, 1)) // 8 * 8
    tile_b = max(8, min(_round_up(B, 8), rows))
    return tile_b, tile_d


def contrastive_loss(output1, output2, label, margin, eps=0.0005,
                     size_average=False):
    """Pallas implementation of ContrastiveLoss.forward.

    output1, output2: arrays of identical shape (batch, feature...) —
                      flattened to (batch, -1). Any float dtype (upcast
                      to f32 inside the kernel).
    label: 1 if same class, else 0 (python int or traced scalar).
    Returns a float32 scalar. (The loss is a scalar, so mean == sum and
    size_average is a no-op, matching the reference module.)
    """
    assert output1.shape == output2.shape
    o1 = output1.reshape(output1.shape[0], -1)
    o2 = output2.reshape(output2.shape[0], -1)
    B, D = o1.shape
    itemsize = jnp.dtype(o1.dtype).itemsize

    tile_b, tile_d = _choose_tiles(B, D, itemsize)
    Bp = _round_up(B, tile_b)
    Dp = _round_up(D, tile_d)
    if (Bp, Dp) != (B, D):
        # Zero-pad BOTH inputs identically: padded positions contribute
        # (0 - 0)^2 == 0 to the sum, so the result is unchanged.
        o1 = jnp.pad(o1, ((0, Bp - B), (0, Dp - D)))
        o2 = jnp.pad(o2, ((0, Bp - B), (0, Dp - D)))

    nb = Bp // tile_b
    nd = Dp // tile_d

    partials = pl.pallas_call(
        _sqdiff_partial_kernel,
        out_shape=jax.ShapeDtypeStruct((nb, nd, 1, 1), jnp.float32),
        grid_spec=pltpu.PrefetchScalarGridSpec(
            num_scalar_prefetch=0,
            grid=(nb, nd),
            in_specs=[
                pl.BlockSpec((tile_b, tile_d), lambda i, j: (i, j)),
                pl.BlockSpec((tile_b, tile_d), lambda i, j: (i, j)),
            ],
            out_specs=pl.BlockSpec((1, 1, 1, 1), lambda i, j: (i, j, 0, 0)),
        ),
        compiler_params=pltpu.CompilerParams(
            dimension_semantics=("parallel", "parallel")),
        cost_estimate=pl.CostEstimate(
            flops=3 * Bp * Dp,
            transcendentals=0,
            bytes_accessed=2 * Bp * Dp * itemsize + nb * nd * 4),
    )(o1, o2)

    # Trivial scalar epilogue (runs as a tiny fused XLA op in the wrapper).
    dist = jnp.sum(partials)
    margin_f = jnp.asarray(margin, dtype=jnp.float32)
    eps_f = jnp.asarray(eps, dtype=jnp.float32)
    neg = jnp.maximum(margin_f - jnp.sqrt(dist), 0.0) ** 2
    losses = jnp.where(jnp.asarray(label) == 1, dist, neg) + eps_f
    # losses is a scalar, so .mean() and .sum() are identical.
    return losses


def _reference(output1, output2, label, margin, eps=0.0005):
    o1 = output1.reshape(output1.shape[0], -1).astype(jnp.float32)
    o2 = output2.reshape(output2.shape[0], -1).astype(jnp.float32)
    dist = jnp.sum((o2 - o1) ** 2)
    if label == 1:
        losses = dist
    else:
        losses = jnp.maximum(margin - jnp.sqrt(dist), 0.0) ** 2
    return losses + eps


if __name__ == "__main__":
    key = jax.random.PRNGKey(0)
    k1, k2, k3, k4 = jax.random.split(key, 4)

    # Small embedding pair: batch=8, hidden=32.
    batch, hidden = 8, 32
    margin = 30.0  # large enough that the negative branch is non-trivial
    out1 = jax.random.normal(k1, (batch, hidden), dtype=jnp.float32)
    out2 = jax.random.normal(k2, (batch, hidden), dtype=jnp.float32)

    # label == 1 (same class) branch
    loss_same = contrastive_loss(out1, out2, label=1, margin=margin)
    jax.block_until_ready(loss_same)
    ref_same = _reference(out1, out2, 1, margin)
    assert jnp.allclose(loss_same, ref_same, rtol=1e-5, atol=1e-5), (
        loss_same, ref_same)

    # label == 0 (different class) branch
    loss_diff = contrastive_loss(out1, out2, label=0, margin=margin)
    jax.block_until_ready(loss_diff)
    ref_diff = _reference(out1, out2, 0, margin)
    assert jnp.allclose(loss_diff, ref_diff, rtol=1e-5, atol=1e-5), (
        loss_diff, ref_diff)

    # Non-(8,128)-aligned shape: exercises the zero-padding path.
    b2, h2 = 10, 200
    a1 = jax.random.normal(k3, (b2, h2), dtype=jnp.float32)
    a2 = jax.random.normal(k4, (b2, h2), dtype=jnp.float32)
    loss_pad = contrastive_loss(a1, a2, label=1, margin=2.0)
    jax.block_until_ready(loss_pad)
    ref_pad = _reference(a1, a2, 1, 2.0)
    assert jnp.allclose(loss_pad, ref_pad, rtol=1e-5, atol=1e-5), (
        loss_pad, ref_pad)

    print("KERNEL_OK")
</pallas_src>

<mosaic_0001>
module attributes {stable_mosaic.version = 11 : i64} {
  func.func @_sqdiff_partial_kernel(%arg0: i32, %arg1: i32, %arg2: memref<8x32xf32, #tpu.memory_space<vmem>>, %arg3: memref<8x32xf32, #tpu.memory_space<vmem>>, %arg4: memref<1x1x1x1xf32, #tpu.memory_space<vmem>>) attributes {dimension_semantics = [#tpu.dimension_semantics<parallel>, #tpu.dimension_semantics<parallel>], iteration_bounds = array<i64: 1, 1>, scalar_prefetch = 0 : i64, scratch_operands = 0 : i64, tpu.core_type = #tpu.core_type<tc>, window_params = [{transform_indices = @transform_0, window_bounds = array<i64: 8, 32>}, {transform_indices = @transform_1, window_bounds = array<i64: 8, 32>}, {transform_indices = @transform_2, window_bounds = array<i64: 1, 1, 1, 1>}]} {
    %c0 = arith.constant 0 : index
    %c0_0 = arith.constant 0 : index
    %0 = vector.load %arg2[%c0, %c0_0] : memref<8x32xf32, #tpu.memory_space<vmem>>, vector<8x32xf32>
    %c0_1 = arith.constant 0 : index
    %c0_2 = arith.constant 0 : index
    %1 = vector.load %arg3[%c0_1, %c0_2] : memref<8x32xf32, #tpu.memory_space<vmem>>, vector<8x32xf32>
    %2 = arith.subf %1, %0 : vector<8x32xf32>
    %3 = arith.mulf %2, %2 : vector<8x32xf32>
    %4 = vector.shape_cast %3 : vector<8x32xf32> to vector<1x8x32xf32>
    %cst = arith.constant dense<0.000000e+00> : vector<1xf32>
    %5 = vector.multi_reduction <add>, %4, %cst [1, 2] : vector<1x8x32xf32> to vector<1xf32>
    %6 = vector.shape_cast %5 : vector<1xf32> to vector<1x1x1xf32>
    %7 = vector.extract %6[0, 0, 0] : f32 from vector<1x1x1xf32>
    %8 = vector.broadcast %7 : f32 to vector<1x1x1x1xf32>
    %c0_3 = arith.constant 0 : index
    %c0_4 = arith.constant 0 : index
    %c0_5 = arith.constant 0 : index
    %c0_6 = arith.constant 0 : index
    %9 = vector.load %arg4[%c0_3, %c0_4, %c0_5, %c0_6] : memref<1x1x1x1xf32, #tpu.memory_space<vmem>>, vector<1x1x1x1xf32>
    tpu.vector_store %arg4[%c0_3, %c0_4, %c0_5, %c0_6], %8 {strides = array<i32>} : memref<1x1x1x1xf32, #tpu.memory_space<vmem>>, vector<1x1x1x1xf32>,
    return
  }
  func.func @transform_0(%arg0: i32, %arg1: i32) -> (i32, i32) {
    %c0_i32 = arith.constant 0 : i32
    return %arg0, %arg1 : i32, i32
  }
  func.func @transform_1(%arg0: i32, %arg1: i32) -> (i32, i32) {
    %c0_i32 = arith.constant 0 : i32
    return %arg0, %arg1 : i32, i32
  }
  func.func @transform_2(%arg0: i32, %arg1: i32) -> (i32, i32, i32, i32) {
    %c0_i32 = arith.constant 0 : i32
    %c0_i32_0 = arith.constant 0 : i32
    %c0_i32_1 = arith.constant 0 : i32
    return %arg0, %arg1, %c0_i32, %c0_i32_0 : i32, i32, i32, i32
  }
}

</mosaic_0001>

<bundles_post_ra>
// kernel: tpu_custom_call.1
= control target key start
LH: loop header
LB: loop body
LE: loop exit
PB: predicated region body
PF: predicated region fallthrough
CT: control target
= control target key end

     0   :  { %7 = vsyncpa [#allocation3], 0  ;;  %s186_s0 = inlined_call_operand.hbm [shape: f32[8,32], index: 0, kind: input, shape index: {}]   ;;  %s187_s1 = inlined_call_operand.hbm [shape: f32[8,32], index: 1, kind: input, shape index: {}]   ;;  %s188_s2 = inlined_call_operand.hbm [shape: f32[1,1,1,1], index: 2, kind: output, shape index: {}]  }
   0x1   :  { %8 = vsyncpa [#allocation6], 0 }
   0x2   :  { %9 = vsyncpa [#allocation4], 0  ;;  %s15_s11 = sshll.u32 %s186_s0, 4  ;;  %s159_s12 = smov [#allocation2]   ;;  %s16_s11 = int_to_ptr.hbm [resolvable:$true] %s15_s11 }
   0x3   :  { %s17_s13 = sshll.u32 %s159_s12, 4  ;;  %s26_s16 = sshll.u32 %s187_s1, 4  ;;  %s18_s13 = int_to_ptr.vmem [resolvable:$true] %s17_s13  ;;  %s27_s16 = int_to_ptr.hbm [resolvable:$true] %s26_s16 }
   0x4   :  { %20 = dma.hbm_to_vmem [thread:$0]  %s16_s11, 128, %s18_s13, [#allocation3]  }
   0x5   :  { %s160_s17 = smov [#allocation5]  }
   0x6   :  { %s28_s18 = sshll.u32 %s160_s17, 4  ;;  %s29_s18 = int_to_ptr.vmem [resolvable:$true] %s28_s18 }
   0x7   :  { %31 = dma.hbm_to_vmem [thread:$0]  %s27_s16, 128, %s29_s18, [#allocation6]  }
   0x8   :  { %153 = dma.done.wait [#allocation3], 128  }
   0x9   :  { %154 = vsyncadd [#allocation3], 4294967168 }
   0xa   :  { %155 = dma.done.wait [#allocation6], 128  }
   0xb   :  { %156 = vsyncadd [#allocation6], 4294967168  ;;  %v40_v0 = vld [vmem:[#allocation2] sm:$0xff]  ;;  %v41_v1 = vld [vmem:[#allocation5] sm:$0xff]  ;;  %vm44_vm0 = vcmask 261120   ;;  %s161_s0 = smov [#allocation7]  }
   0xc   :  { %v42_v2 = vsub.f32 %v41_v1, %v40_v0  ;;  %s63_s1 = sshll.u32 %s161_s0, 4  ;;  %s65_s21 = sshll.u32 %s188_s2, 4  ;;  %vm56_vm1 = vcmask 0   ;;  %s64_s1 = int_to_ptr.vmem [resolvable:$true] %s63_s1  ;;  %s66_s21 = int_to_ptr.hbm [resolvable:$true] %s65_s21 }
   0xe   :  { %v43_v3 = vmul.f32 %v42_v2, %v42_v2 }
  0x10   :  { %v45_v4 = vsel %vm44_vm0, %v43_v3, 0.0 }
  0x11   :  { %46 = vadd.xlane.f32.xlu0 %v45_v4 }
  0x84   :  { %v47_v5 = vpop.xlane.xlu0 %46 }
  0x85   :  { %v48_v6 = vrot.slane %v47_v5, 4 }
  0x87   :  { %v49_v7 = vadd.f32 %v48_v6, %v47_v5 }
  0x89   :  { %v50_v8 = vrot.slane %v49_v7, 2 }
  0x8b   :  { %v51_v9 = vadd.f32 %v50_v8, %v49_v7 }
  0x8d   :  { %v52_v10 = vrot.slane %v51_v9, 1 }
  0x8f   :  { %v53_v11 = vadd.f32 %v52_v10, %v51_v9 }
  0x91   :  { %76 = vpush %v53_v11 }
  0xc2   :  { %s77_s22 = spop %76 }
  0xc3   :  { %v55_v12 = vstv %s77_s22 }
  0xc4   :  { %57 = vst.msk [vmem:[#allocation7] sm:$0x1] %vm56_vm1, %v55_v12 }
  0xc5   :  { %68 = dma.vmem_to_hbm [thread:$0]  %s64_s1, 16, %s66_s21, [#allocation4]  }
  0xc6   :  { %157 = dma.done.wait [#allocation4], 16  }
  0xc7   :  { %158 = vsyncadd [#allocation4], 4294967280 }
  0xc8   :  { %73 = vsyncpa [#allocation3], 1 }
  0xc9   :  { %74 = vsyncpa [#allocation6], 1 }
  0xca   :  { %75 = vsyncpa [#allocation4], 1 }

</bundles_post_ra>
